<compile_context>
chip_gen: v6e
topology: v6e:2x2x1
jax: 0.10.0
libtpu: 0.0.40
codegen_flags: <defaults>
</compile_context>

<pallas_src>
import functools
import math

import jax
import jax.numpy as jnp
from jax import lax
from jax.experimental import pallas as pl
from jax.experimental.pallas import tpu as pltpu

PI = 0.5
SIGMA_1 = math.exp(0.0)    # 1.0
SIGMA_2 = math.exp(-6.0)
LOG_SQRT_2PI = 0.5 * math.log(2.0 * math.pi)

# Trace-time constants for the scale-mixture prior, fully folded:
#   log(pi*N(v;0,s1) + (1-pi)*N(v;0,s2))
#     = -LOG_SQRT_2PI + logaddexp(C1 - A1*v^2, C2 - A2*v^2)
_MIX_C1 = math.log(PI) - math.log(SIGMA_1)
_MIX_C2 = math.log(1.0 - PI) - math.log(SIGMA_2)
_MIX_A1 = 0.5 / (SIGMA_1 ** 2)
_MIX_A2 = 0.5 / (SIGMA_2 ** 2)


def _softplus(x):
    # Numerically stable log1p(exp(x)).
    return jnp.maximum(x, 0.0) + jnp.log1p(jnp.exp(-jnp.abs(x)))


def _logaddexp(a, b):
    # Stable log(exp(a) + exp(b)) for finite a, b (elementwise; VPU + EUP only).
    m = jnp.maximum(a, b)
    return m + jnp.log1p(jnp.exp(-jnp.abs(a - b)))


def _bayesian_linear_kernel(x_ref, wmu_ref, wrho_ref, bmu_ref, brho_ref,
                            eps_w_ref, eps_b_ref,
                            out_ref, logp_ref, logq_ref,
                            *, out_features, in_features):
    # ---- reparameterized sampling (elementwise, VPU/EUP) ----
    wmu = wmu_ref[...]
    w_sigma = _softplus(wrho_ref[...])
    eps_w = eps_w_ref[...]
    w = wmu + w_sigma * eps_w                       # [OUT_P, IN_P]

    bmu = bmu_ref[...]
    b_sigma = _softplus(brho_ref[...])
    eps_b = eps_b_ref[...]
    b = bmu + b_sigma * eps_b                       # [1, OUT_P]

    # ---- F.linear: x @ W.T + b (MXU), contraction expressed directly so the
    # freshly built W tile is never transposed/relayouted before the MXU push.
    out_ref[...] = lax.dot_general(
        x_ref[...], w,
        dimension_numbers=(((1,), (1,)), ((), ())),
        preferred_element_type=jnp.float32) + b

    # ---- validity masks for the lane-padded regions (static shapes) ----
    w_row = lax.broadcasted_iota(jnp.int32, w.shape, 0)
    w_col = lax.broadcasted_iota(jnp.int32, w.shape, 1)
    w_mask = (w_row < out_features) & (w_col < in_features)
    b_mask = lax.broadcasted_iota(jnp.int32, b.shape, 1) < out_features

    n_total = out_features * in_features + out_features  # real (unpadded) element count

    # ---- log variational posterior: log N(value; mu, sigma), summed.
    # Since w = mu + sigma*eps, (w - mu)^2 / (2 sigma^2) == 0.5 * eps^2;
    # the -LOG_SQRT_2PI constant is added once outside the reduction.
    lq_w = -jnp.log(w_sigma) - 0.5 * eps_w * eps_w
    lq_b = -jnp.log(b_sigma) - 0.5 * eps_b * eps_b
    logq_ref[0, 0] = (jnp.sum(jnp.where(w_mask, lq_w, 0.0))
                      + jnp.sum(jnp.where(b_mask, lq_b, 0.0))
                      - n_total * LOG_SQRT_2PI)

    # ---- log prior: scale-mixture-of-Gaussians, in log-sum-exp form.
    def mixture_log_prob_unnormalized(v):
        v2 = v * v
        return _logaddexp(_MIX_C1 - _MIX_A1 * v2, _MIX_C2 - _MIX_A2 * v2)

    lp_w = mixture_log_prob_unnormalized(w)
    lp_b = mixture_log_prob_unnormalized(b)
    logp_ref[0, 0] = (jnp.sum(jnp.where(w_mask, lp_w, 0.0))
                      + jnp.sum(jnp.where(b_mask, lp_b, 0.0))
                      - n_total * LOG_SQRT_2PI)


def _round_up(n, m):
    return ((n + m - 1) // m) * m


def _pad_to(a, shape):
    pads = [(0, t - s) for s, t in zip(a.shape, shape)]
    if all(p == (0, 0) for p in pads):
        return a
    return jnp.pad(a, pads)


def bayesian_linear_forward(x, weight_mu, weight_rho, bias_mu, bias_rho,
                            eps_w, eps_b):
    """Sampled BayesianLinear forward pass in a single fused Pallas kernel.

    Returns (output [B, out_features], log_prior [], log_variational_posterior [])."""
    B, in_f = x.shape
    out_f = weight_mu.shape[0]

    b_p = _round_up(B, 8)          # sublane-aligned batch
    in_p = _round_up(in_f, 128)    # lane-dense contraction (K) dim
    out_p = _round_up(out_f, 128)  # lane-dense output (N) dim -> unmasked vst, full MXU width

    x_p = _pad_to(x.astype(jnp.float32), (b_p, in_p))
    wmu_p = _pad_to(weight_mu, (out_p, in_p))
    wrho_p = _pad_to(weight_rho, (out_p, in_p))
    eps_w_p = _pad_to(eps_w, (out_p, in_p))
    bmu_p = _pad_to(bias_mu.reshape(1, out_f), (1, out_p))
    brho_p = _pad_to(bias_rho.reshape(1, out_f), (1, out_p))
    eps_b_p = _pad_to(eps_b.reshape(1, out_f), (1, out_p))

    full = lambda shape: pl.BlockSpec(shape, lambda: tuple(0 for _ in shape))
    smem_scalar = lambda: pl.BlockSpec(memory_space=pltpu.MemorySpace.SMEM)

    kernel = functools.partial(_bayesian_linear_kernel,
                               out_features=out_f, in_features=in_f)

    out_padded, logp, logq = pl.pallas_call(
        kernel,
        out_shape=(
            jax.ShapeDtypeStruct((b_p, out_p), jnp.float32),
            jax.ShapeDtypeStruct((1, 1), jnp.float32),
            jax.ShapeDtypeStruct((1, 1), jnp.float32),
        ),
        in_specs=[
            full((b_p, in_p)),
            full((out_p, in_p)), full((out_p, in_p)),
            full((1, out_p)), full((1, out_p)),
            full((out_p, in_p)),
            full((1, out_p)),
        ],
        out_specs=(
            full((b_p, out_p)),   # lane-dense VMEM output
            smem_scalar(),        # log_prior scalar -> SMEM
            smem_scalar(),        # log_variational_posterior scalar -> SMEM
        ),
    )(x_p, wmu_p, wrho_p, bmu_p, brho_p, eps_w_p, eps_b_p)

    return out_padded[:B, :out_f], logp[0, 0], logq[0, 0]


def _reference(x, wmu, wrho, bmu, brho, eps_w, eps_b):
    """Pure-JAX reference matching the PyTorch module (naive formulation)."""
    w_sigma = jnp.log1p(jnp.exp(wrho))
    b_sigma = jnp.log1p(jnp.exp(brho))
    w = wmu + w_sigma * eps_w
    b = bmu + b_sigma * eps_b
    out = x @ w.T + b

    def gauss_lp(v, mu, sig):
        return -LOG_SQRT_2PI - jnp.log(sig) - (v - mu) ** 2 / (2.0 * sig ** 2)

    def mix_lp(v):
        p1 = jnp.exp(gauss_lp(v, 0.0, SIGMA_1))
        p2 = jnp.exp(gauss_lp(v, 0.0, SIGMA_2))
        return jnp.log(PI * p1 + (1.0 - PI) * p2)

    logp = jnp.sum(mix_lp(w)) + jnp.sum(mix_lp(b))
    logq = jnp.sum(gauss_lp(w, wmu, w_sigma)) + jnp.sum(gauss_lp(b, bmu, b_sigma))
    return out, logp, logq


if __name__ == "__main__":
    # Small shapes consistent with the breast-cancer BNN (≈30 input features).
    B, IN_F, OUT_F = 8, 32, 16

    key = jax.random.PRNGKey(0)
    k_x, k_wm, k_wr, k_bm, k_br, k_ew, k_eb = jax.random.split(key, 7)

    x = jax.random.normal(k_x, (B, IN_F), dtype=jnp.float32)

    # Deterministic parameter init matching the PyTorch __init__ ranges.
    weight_mu = jax.random.uniform(k_wm, (OUT_F, IN_F), jnp.float32, -0.2, 0.2)
    weight_rho = jax.random.uniform(k_wr, (OUT_F, IN_F), jnp.float32, -5.0, -4.0)
    bias_mu = jax.random.uniform(k_bm, (1, OUT_F), jnp.float32, -0.2, 0.2)
    bias_rho = jax.random.uniform(k_br, (1, OUT_F), jnp.float32, -5.0, -4.0)

    # Reparameterization noise (the "sample()" epsilon), generated outside the kernel.
    eps_w = jax.random.normal(k_ew, (OUT_F, IN_F), dtype=jnp.float32)
    eps_b = jax.random.normal(k_eb, (1, OUT_F), dtype=jnp.float32)

    out, log_prior, log_var_post = bayesian_linear_forward(
        x, weight_mu, weight_rho, bias_mu, bias_rho, eps_w, eps_b)
    jax.block_until_ready((out, log_prior, log_var_post))

    # Cross-check against a pure-JAX reference.
    ref_out, ref_logp, ref_logq = _reference(
        x, weight_mu, weight_rho, bias_mu, bias_rho, eps_w, eps_b)
    assert out.shape == (B, OUT_F)
    assert jnp.allclose(out, ref_out, atol=1e-4, rtol=1e-4)
    assert jnp.allclose(log_prior, ref_logp, atol=1e-2, rtol=1e-4)
    assert jnp.allclose(log_var_post, ref_logq, atol=1e-2, rtol=1e-4)

    print("KERNEL_OK")
</pallas_src>

<mosaic_0001>
module attributes {stable_mosaic.version = 11 : i64} {
  func.func @_bayesian_linear_kernel(%arg0: memref<8x128xf32, #tpu.memory_space<vmem>>, %arg1: memref<128x128xf32, #tpu.memory_space<vmem>>, %arg2: memref<128x128xf32, #tpu.memory_space<vmem>>, %arg3: memref<1x128xf32, #tpu.memory_space<vmem>>, %arg4: memref<1x128xf32, #tpu.memory_space<vmem>>, %arg5: memref<128x128xf32, #tpu.memory_space<vmem>>, %arg6: memref<1x128xf32, #tpu.memory_space<vmem>>, %arg7: memref<8x128xf32, #tpu.memory_space<vmem>>, %arg8: memref<1x1xf32, #tpu.memory_space<smem>>, %arg9: memref<1x1xf32, #tpu.memory_space<smem>>) attributes {dimension_semantics = [], scalar_prefetch = 0 : i64, scratch_operands = 0 : i64, tpu.core_type = #tpu.core_type<tc>} {
    %c0 = arith.constant 0 : index
    %c0_0 = arith.constant 0 : index
    %0 = vector.load %arg1[%c0, %c0_0] : memref<128x128xf32, #tpu.memory_space<vmem>>, vector<128x128xf32>
    %c0_1 = arith.constant 0 : index
    %c0_2 = arith.constant 0 : index
    %1 = vector.load %arg2[%c0_1, %c0_2] : memref<128x128xf32, #tpu.memory_space<vmem>>, vector<128x128xf32>
    %cst = arith.constant 0.000000e+00 : f32
    %2 = vector.broadcast %cst : f32 to vector<128x128xf32>
    %3 = arith.maximumf %1, %2 : vector<128x128xf32>
    %4 = math.absf %1 : vector<128x128xf32>
    %cst_3 = arith.constant 0.000000e+00 : f32
    %5 = vector.broadcast %cst_3 : f32 to vector<128x128xf32>
    %6 = arith.subf %5, %4 : vector<128x128xf32>
    %7 = math.exp %6 : vector<128x128xf32>
    %8 = math.log1p %7 : vector<128x128xf32>
    %9 = arith.addf %3, %8 : vector<128x128xf32>
    %c0_4 = arith.constant 0 : index
    %c0_5 = arith.constant 0 : index
    %10 = vector.load %arg5[%c0_4, %c0_5] : memref<128x128xf32, #tpu.memory_space<vmem>>, vector<128x128xf32>
    %11 = arith.mulf %9, %10 : vector<128x128xf32>
    %12 = arith.addf %0, %11 : vector<128x128xf32>
    %c0_6 = arith.constant 0 : index
    %c0_7 = arith.constant 0 : index
    %13 = vector.load %arg3[%c0_6, %c0_7] : memref<1x128xf32, #tpu.memory_space<vmem>>, vector<1x128xf32>
    %c0_8 = arith.constant 0 : index
    %c0_9 = arith.constant 0 : index
    %14 = vector.load %arg4[%c0_8, %c0_9] : memref<1x128xf32, #tpu.memory_space<vmem>>, vector<1x128xf32>
    %cst_10 = arith.constant 0.000000e+00 : f32
    %15 = vector.broadcast %cst_10 : f32 to vector<1x128xf32>
    %16 = arith.maximumf %14, %15 : vector<1x128xf32>
    %17 = math.absf %14 : vector<1x128xf32>
    %cst_11 = arith.constant 0.000000e+00 : f32
    %18 = vector.broadcast %cst_11 : f32 to vector<1x128xf32>
    %19 = arith.subf %18, %17 : vector<1x128xf32>
    %20 = math.exp %19 : vector<1x128xf32>
    %21 = math.log1p %20 : vector<1x128xf32>
    %22 = arith.addf %16, %21 : vector<1x128xf32>
    %c0_12 = arith.constant 0 : index
    %c0_13 = arith.constant 0 : index
    %23 = vector.load %arg6[%c0_12, %c0_13] : memref<1x128xf32, #tpu.memory_space<vmem>>, vector<1x128xf32>
    %24 = arith.mulf %22, %23 : vector<1x128xf32>
    %25 = arith.addf %13, %24 : vector<1x128xf32>
    %c0_14 = arith.constant 0 : index
    %c0_15 = arith.constant 0 : index
    %26 = vector.load %arg0[%c0_14, %c0_15] : memref<8x128xf32, #tpu.memory_space<vmem>>, vector<8x128xf32>
    %cst_16 = arith.constant dense<0.000000e+00> : vector<8x128xf32>
    %27 = tpu.matmul %26, %12, %cst_16 {dimension_numbers = #tpu.dot_dimension_numbers<[1], [1], [0], [0], [0, 0, 1, 0], [], []>} : vector<8x128xf32>, vector<128x128xf32>, vector<8x128xf32> -> vector<8x128xf32>
    %28 = vector.broadcast %25 : vector<1x128xf32> to vector<8x128xf32>
    %29 = arith.addf %27, %28 : vector<8x128xf32>
    %c0_17 = arith.constant 0 : index
    %c0_18 = arith.constant 0 : index
    %30 = vector.load %arg7[%c0_17, %c0_18] : memref<8x128xf32, #tpu.memory_space<vmem>>, vector<8x128xf32>
    tpu.vector_store %arg7[%c0_17, %c0_18], %29 {strides = array<i32>} : memref<8x128xf32, #tpu.memory_space<vmem>>, vector<8x128xf32>,
    %31 = tpu.iota {dimensions = array<i32: 0>} : vector<128x128xi32>
    %32 = tpu.iota {dimensions = array<i32: 1>} : vector<128x128xi32>
    %c16_i32 = arith.constant 16 : i32
    %33 = vector.broadcast %c16_i32 : i32 to vector<128x128xi32>
    %34 = arith.cmpi slt, %31, %33 : vector<128x128xi32>
    %c32_i32 = arith.constant 32 : i32
    %35 = vector.broadcast %c32_i32 : i32 to vector<128x128xi32>
    %36 = arith.cmpi slt, %32, %35 : vector<128x128xi32>
    %37 = arith.andi %34, %36 : vector<128x128xi1>
    %38 = tpu.iota {dimensions = array<i32: 1>} : vector<1x128xi32>
    %c16_i32_19 = arith.constant 16 : i32
    %39 = vector.broadcast %c16_i32_19 : i32 to vector<1x128xi32>
    %40 = arith.cmpi slt, %38, %39 : vector<1x128xi32>
    %41 = math.log %9 : vector<128x128xf32>
    %cst_20 = arith.constant 0.000000e+00 : f32
    %42 = vector.broadcast %cst_20 : f32 to vector<128x128xf32>
    %43 = arith.subf %42, %41 : vector<128x128xf32>
    %cst_21 = arith.constant 5.000000e-01 : f32
    %44 = vector.broadcast %cst_21 : f32 to vector<128x128xf32>
    %45 = arith.mulf %44, %10 : vector<128x128xf32>
    %46 = arith.mulf %45, %10 : vector<128x128xf32>
    %47 = arith.subf %43, %46 : vector<128x128xf32>
    %48 = math.log %22 : vector<1x128xf32>
    %cst_22 = arith.constant 0.000000e+00 : f32
    %49 = vector.broadcast %cst_22 : f32 to vector<1x128xf32>
    %50 = arith.subf %49, %48 : vector<1x128xf32>
    %cst_23 = arith.constant 5.000000e-01 : f32
    %51 = vector.broadcast %cst_23 : f32 to vector<1x128xf32>
    %52 = arith.mulf %51, %23 : vector<1x128xf32>
    %53 = arith.mulf %52, %23 : vector<1x128xf32>
    %54 = arith.subf %50, %53 : vector<1x128xf32>
    %cst_24 = arith.constant 0.000000e+00 : f32
    %55 = vector.broadcast %cst_24 : f32 to vector<128x128xf32>
    %56 = arith.select %37, %47, %55 : vector<128x128xi1>, vector<128x128xf32>
    %57 = vector.shape_cast %56 : vector<128x128xf32> to vector<1x128x128xf32>
    %cst_25 = arith.constant dense<0.000000e+00> : vector<1xf32>
    %58 = vector.multi_reduction <add>, %57, %cst_25 [1, 2] : vector<1x128x128xf32> to vector<1xf32>
    %59 = vector.shape_cast %58 : vector<1xf32> to vector<1x1x1xf32>
    %60 = vector.extract %59[0, 0, 0] : f32 from vector<1x1x1xf32>
    %cst_26 = arith.constant 0.000000e+00 : f32
    %61 = vector.broadcast %cst_26 : f32 to vector<1x128xf32>
    %62 = arith.select %40, %54, %61 : vector<1x128xi1>, vector<1x128xf32>
    %63 = vector.shape_cast %62 : vector<1x128xf32> to vector<1x1x128xf32>
    %cst_27 = arith.constant dense<0.000000e+00> : vector<1xf32>
    %64 = vector.multi_reduction <add>, %63, %cst_27 [1, 2] : vector<1x1x128xf32> to vector<1xf32>
    %65 = vector.shape_cast %64 : vector<1xf32> to vector<1x1x1xf32>
    %66 = vector.extract %65[0, 0, 0] : f32 from vector<1x1x1xf32>
    %67 = arith.addf %60, %66 : f32
    %cst_28 = arith.constant 485.199554 : f32
    %68 = arith.subf %67, %cst_28 : f32
    %c0_29 = arith.constant 0 : index
    %c0_30 = arith.constant 0 : index
    %69 = memref.load %arg9[%c0_29, %c0_30] : memref<1x1xf32, #tpu.memory_space<smem>>
    memref.store %68, %arg9[%c0_29, %c0_30] : memref<1x1xf32, #tpu.memory_space<smem>>
    %70 = arith.mulf %12, %12 : vector<128x128xf32>
    %cst_31 = arith.constant 5.000000e-01 : f32
    %71 = vector.broadcast %cst_31 : f32 to vector<128x128xf32>
    %72 = arith.mulf %71, %70 : vector<128x128xf32>
    %cst_32 = arith.constant -0.693147182 : f32
    %73 = vector.broadcast %cst_32 : f32 to vector<128x128xf32>
    %74 = arith.subf %73, %72 : vector<128x128xf32>
    %cst_33 = arith.constant 81377.3984 : f32
    %75 = vector.broadcast %cst_33 : f32 to vector<128x128xf32>
    %76 = arith.mulf %75, %70 : vector<128x128xf32>
    %cst_34 = arith.constant 5.30685282 : f32
    %77 = vector.broadcast %cst_34 : f32 to vector<128x128xf32>
    %78 = arith.subf %77, %76 : vector<128x128xf32>
    %79 = arith.maximumf %74, %78 : vector<128x128xf32>
    %80 = arith.subf %74, %78 : vector<128x128xf32>
    %81 = math.absf %80 : vector<128x128xf32>
    %cst_35 = arith.constant 0.000000e+00 : f32
    %82 = vector.broadcast %cst_35 : f32 to vector<128x128xf32>
    %83 = arith.subf %82, %81 : vector<128x128xf32>
    %84 = math.exp %83 : vector<128x128xf32>
    %85 = math.log1p %84 : vector<128x128xf32>
    %86 = arith.addf %79, %85 : vector<128x128xf32>
    %87 = arith.mulf %25, %25 : vector<1x128xf32>
    %cst_36 = arith.constant 5.000000e-01 : f32
    %88 = vector.broadcast %cst_36 : f32 to vector<1x128xf32>
    %89 = arith.mulf %88, %87 : vector<1x128xf32>
    %cst_37 = arith.constant -0.693147182 : f32
    %90 = vector.broadcast %cst_37 : f32 to vector<1x128xf32>
    %91 = arith.subf %90, %89 : vector<1x128xf32>
    %cst_38 = arith.constant 81377.3984 : f32
    %92 = vector.broadcast %cst_38 : f32 to vector<1x128xf32>
    %93 = arith.mulf %92, %87 : vector<1x128xf32>
    %cst_39 = arith.constant 5.30685282 : f32
    %94 = vector.broadcast %cst_39 : f32 to vector<1x128xf32>
    %95 = arith.subf %94, %93 : vector<1x128xf32>
    %96 = arith.maximumf %91, %95 : vector<1x128xf32>
    %97 = arith.subf %91, %95 : vector<1x128xf32>
    %98 = math.absf %97 : vector<1x128xf32>
    %cst_40 = arith.constant 0.000000e+00 : f32
    %99 = vector.broadcast %cst_40 : f32 to vector<1x128xf32>
    %100 = arith.subf %99, %98 : vector<1x128xf32>
    %101 = math.exp %100 : vector<1x128xf32>
    %102 = math.log1p %101 : vector<1x128xf32>
    %103 = arith.addf %96, %102 : vector<1x128xf32>
    %cst_41 = arith.constant 0.000000e+00 : f32
    %104 = vector.broadcast %cst_41 : f32 to vector<128x128xf32>
    %105 = arith.select %37, %86, %104 : vector<128x128xi1>, vector<128x128xf32>
    %106 = vector.shape_cast %105 : vector<128x128xf32> to vector<1x128x128xf32>
    %cst_42 = arith.constant dense<0.000000e+00> : vector<1xf32>
    %107 = vector.multi_reduction <add>, %106, %cst_42 [1, 2] : vector<1x128x128xf32> to vector<1xf32>
    %108 = vector.shape_cast %107 : vector<1xf32> to vector<1x1x1xf32>
    %109 = vector.extract %108[0, 0, 0] : f32 from vector<1x1x1xf32>
    %cst_43 = arith.constant 0.000000e+00 : f32
    %110 = vector.broadcast %cst_43 : f32 to vector<1x128xf32>
    %111 = arith.select %40, %103, %110 : vector<1x128xi1>, vector<1x128xf32>
    %112 = vector.shape_cast %111 : vector<1x128xf32> to vector<1x1x128xf32>
    %cst_44 = arith.constant dense<0.000000e+00> : vector<1xf32>
    %113 = vector.multi_reduction <add>, %112, %cst_44 [1, 2] : vector<1x1x128xf32> to vector<1xf32>
    %114 = vector.shape_cast %113 : vector<1xf32> to vector<1x1x1xf32>
    %115 = vector.extract %114[0, 0, 0] : f32 from vector<1x1x1xf32>
    %116 = arith.addf %109, %115 : f32
    %cst_45 = arith.constant 485.199554 : f32
    %117 = arith.subf %116, %cst_45 : f32
    %c0_46 = arith.constant 0 : index
    %c0_47 = arith.constant 0 : index
    %118 = memref.load %arg8[%c0_46, %c0_47] : memref<1x1xf32, #tpu.memory_space<smem>>
    memref.store %117, %arg8[%c0_46, %c0_47] : memref<1x1xf32, #tpu.memory_space<smem>>
    return
  }
}

</mosaic_0001>

<bundles_post_ra>
// kernel: tpu_custom_call.1
= control target key start
LH: loop header
LB: loop body
LE: loop exit
PB: predicated region body
PF: predicated region fallthrough
CT: control target
= control target key end

     0   :  { %15 = vsyncpa [#allocation3], 0  ;;  %s1921_s0 = inlined_call_operand.hbm [shape: f32[8,128], index: 0, kind: input, shape index: {}]   ;;  %s1922_s1 = inlined_call_operand.hbm [shape: f32[128,128], index: 1, kind: input, shape index: {}]   ;;  %s1923_s2 = inlined_call_operand.hbm [shape: f32[128,128], index: 2, kind: input, shape index: {}]   ;;  %s1924_s3 = inlined_call_operand.vmem [shape: f32[1,128], index: 3, kind: input, shape index: {}]   ;;  %s1925_s4 = inlined_call_operand.vmem [shape: f32[1,128], index: 4, kind: input, shape index: {}]   ;;  %s1926_s5 = inlined_call_operand.hbm [shape: f32[128,128], index: 5, kind: input, shape index: {}]   ;;  %s1927_s6 = inlined_call_operand.vmem [shape: f32[1,128], index: 6, kind: input, shape index: {}]   ;;  %s1928_s7 = inlined_call_operand.hbm [shape: f32[8,128], index: 7, kind: output, shape index: {0}]   ;;  %s1929_s8 = inlined_call_operand.hbm [shape: f32[1,1], index: 8, kind: output, shape index: {1}]   ;;  %s1930_s9 = inlined_call_operand.hbm [shape: f32[1,1], index: 9, kind: output, shape index: {2}]  }
   0x1   :  { %16 = vsyncpa [#allocation7], 0 }
   0x2   :  { %17 = vsyncpa [#allocation10], 0 }
   0x3   :  { %18 = vsyncpa [#allocation4], 0 }
   0x4   :  { %19 = vsyncpa [#allocation5], 0 }
   0x5   :  { %20 = vsyncpa [#allocation14], 0  ;;  %s1455_s30 = smov [#allocation6]  }
   0x6   :  { %s36_s10 = sshll.u32 %s1455_s30, 4  ;;  %s37_s10 = int_to_ptr.vmem [resolvable:$true] %s36_s10 }
   0x7   :  { %s1335_s11 = scalar_lea.vmem %s37_s10, 2048  ;;  %p1340_p1 = scmp.lt.s32.totalorder %s37_s10, %s37_s10 }
   0x8   :  { %p1336_p0 = scmp.ne.s32.totalorder %s37_s10, %s1335_s11  ;;  %p1341_p2 = scmp.lt.s32.totalorder %s1335_s11, %s1335_s11 }
   0xa   :  { %p1342_p3 = por %p1341_p2, %p1340_p1 }
   0xc   :  { %p1343_p4 = pnand %p1342_p3, %p1336_p0 }
   0xe   :  { %1346 = shalt.err (!%p1343_p4)
}
   0xf   :  { %s1456_s12 = smov 128   ;;  %s1457_s13 = smov 8  }
  0x10   :  { %42 = dma.hbm_to_vmem [thread:$0]  %s1922_s1, 2048, %s37_s10, [#allocation7], %s1456_s12, %s1456_s12, %s1457_s13  }
  0x11   :  { %s1458_s16 = smov [#allocation2]   ;;  %s1459_s18 = smov [#allocation8]  }
  0x12   :  { %s27_s17 = sshll.u32 %s1458_s16, 4  ;;  %s48_s19 = sshll.u32 %s1459_s18, 4  ;;  %s28_s17 = int_to_ptr.vmem [resolvable:$true] %s27_s17  ;;  %s49_s19 = int_to_ptr.vmem [resolvable:$true] %s48_s19 }
  0x13   :  { %s1355_s20 = scalar_lea.vmem %s28_s17, 128  ;;  %p1360_p6 = scmp.lt.s32.totalorder %s28_s17, %s28_s17 }
  0x14   :  { %p1356_p5 = scmp.ne.s32.totalorder %s28_s17, %s1355_s20  ;;  %p1361_p7 = scmp.lt.s32.totalorder %s1355_s20, %s1355_s20 }
  0x16   :  { %p1362_p8 = por %p1361_p7, %p1360_p6 }
  0x18   :  { %p1363_p9 = pnand %p1362_p8, %p1356_p5 }
  0x1a   :  { %1366 = shalt.err (!%p1363_p9)
}
  0x1b   :  { %30 = dma.hbm_to_vmem [thread:$0]  %s1921_s0, 128, %s28_s17, [#allocation3]  }
  0x1c   :  { %s1375_s23 = scalar_lea.vmem %s49_s19, 2048  ;;  %p1380_p11 = scmp.lt.s32.totalorder %s49_s19, %s49_s19 }
  0x1d   :  { %p1376_p10 = scmp.ne.s32.totalorder %s49_s19, %s1375_s23  ;;  %p1381_p12 = scmp.lt.s32.totalorder %s1375_s23, %s1375_s23 }
  0x1f   :  { %p1382_p13 = por %p1381_p12, %p1380_p11 }
  0x21   :  { %p1383_p0 = pnand %p1382_p13, %p1376_p10 }
  0x23   :  { %1386 = shalt.err (!%p1383_p0)
}
  0x24   :  { %54 = dma.hbm_to_vmem [thread:$0]  %s1923_s2, 2048, %s49_s19, [#allocation7], %s1456_s12, %s1456_s12, %s1457_s13  }
  0x25   :  { %s1460_s25 = smov [#allocation9]  }
  0x26   :  { %s64_s26 = sshll.u32 %s1460_s25, 4  ;;  %s65_s26 = int_to_ptr.vmem [resolvable:$true] %s64_s26 }
  0x27   :  { %s1395_s27 = scalar_lea.vmem %s65_s26, 2048  ;;  %p1400_p2 = scmp.lt.s32.totalorder %s65_s26, %s65_s26 }
  0x28   :  { %p1396_p1 = scmp.ne.s32.totalorder %s65_s26, %s1395_s27  ;;  %p1401_p3 = scmp.lt.s32.totalorder %s1395_s27, %s1395_s27 }
  0x2a   :  { %p1402_p4 = por %p1401_p3, %p1400_p2 }
  0x2c   :  { %p1403_p5 = pnand %p1402_p4, %p1396_p1 }
  0x2e   :  { %1406 = shalt.err (!%p1403_p5)
}
  0x2f   :  { %70 = dma.hbm_to_vmem [thread:$0]  %s1926_s5, 2048, %s65_s26, [#allocation10], %s1456_s12, %s1456_s12, %s1457_s13  }
  0x30   :  { %1443 = dma.done.wait [#allocation3], 128  }
  0x31   :  { %1444 = vsyncadd [#allocation3], 4294967168 }
  0x32   :  { %1445 = dma.done.wait [#allocation7], 4096  }
  0x33   :  { %1446 = vsyncadd [#allocation7], 4294963200 }
  0x34   :  { %1447 = dma.done.wait [#allocation10], 2048  }
  0x35   :  { %1448 = vsyncadd [#allocation10], 4294965248  ;;  %v1461_v0 = vmov 0.0   ;;  %v1538_v1 = vld [vmem:[#allocation8 + $0x78] sm:$0xff]  ;;  %v1541_v3 = vld [vmem:[#allocation8 + $0x70] sm:$0xff]  ;;  %vm1462_vm9 = vmmov 0  }
  0x36   :  { %1187 = vmatprep.subr.mxu0 %v1461_v0  ;;  %v148_v2 = vand.u32 2147483647, %v1538_v1  ;;  %v147_v4 = vand.u32 2147483647, %v1541_v3  ;;  %v1544_v5 = vld [vmem:[#allocation8 + $0x68] sm:$0xff]  ;;  %v1547_v8 = vld [vmem:[#allocation8 + $0x60] sm:$0xff]  ;;  %1219 = vmatprep.mubr.msk.f32.mxu0 %vm1462_vm9, %v1461_v0 }
  0x37   :  { %v146_v7 = vand.u32 2147483647, %v1544_v5  ;;  %v145_v10 = vand.u32 2147483647, %v1547_v8  ;;  %v1550_v13 = vld [vmem:[#allocation8 + $0x58] sm:$0xff]  ;;  %v1553_v18 = vld [vmem:[#allocation8 + $0x50] sm:$0xff] }
  0x38   :  { %v164_v6 = vsub.f32 0.0, %v148_v2  ;;  %v163_v9 = vsub.f32 0.0, %v147_v4  ;;  %v144_v16 = vand.u32 2147483647, %v1550_v13  ;;  %v1555_v21 = vld [vmem:[#allocation8 + $0x48] sm:$0xff]  ;;  %v1559_v25 = vld [vmem:[#allocation8 + $0x40] sm:$0xff] }
  0x39   :  { %v162_v12 = vsub.f32 0.0, %v146_v7  ;;  %v161_v15 = vsub.f32 0.0, %v145_v10  ;;  %v143_v22 = vand.u32 2147483647, %v1553_v18  ;;  %v142_v23 = vand.u32 2147483647, %v1555_v21 }
  0x3a   :  { %v195_v11 = vmul.f32 1.442695, %v164_v6  ;;  %v193_v14 = vmul.f32 1.442695, %v163_v9  ;;  %v160_v20 = vsub.f32 0.0, %v144_v16  ;;  %v1562_v29 = vld [vmem:[#allocation8 + $0x38] sm:$0xff] }
  0x3b   :  { %v191_v17 = vmul.f32 1.442695, %v162_v12  ;;  %v189_v19 = vmul.f32 1.442695, %v161_v15  ;;  %v159_v26 = vsub.f32 0.0, %v143_v22  ;;  %v158_v27 = vsub.f32 0.0, %v142_v23 }
  0x3c   :  { %1241 = vpow2.f32 %v195_v11  ;;  %v187_v24 = vmul.f32 1.442695, %v160_v20  ;;  %v141_v28 = vand.u32 2147483647, %v1559_v25  ;;  %v140_v30 = vand.u32 2147483647, %v1562_v29 }
  0x3d   :  { %1243 = vpow2.f32 %v193_v14  ;;  %v1565_v31 = vld [vmem:[#allocation8 + $0x30] sm:$0xff]  ;;  %v185_v32 = vmul.f32 1.442695, %v159_v26  ;;  %v183_v33 = vmul.f32 1.442695, %v158_v27  ;;  %v1568_v37 = vld [vmem:[#allocation8 + $0x28] sm:$0xff] }
  0x3e   :  { %1245 = vpow2.f32 %v191_v17  ;;  %v157_v34 = vsub.f32 0.0, %v141_v28  ;;  %v156_v35 = vsub.f32 0.0, %v140_v30  ;;  %v139_v36 = vand.u32 2147483647, %v1565_v31  ;;  %v1571_v52 = vld [vmem:[#allocation8] sm:$0xff]  ;;  %v1576_v57 = vld [vmem:[#allocation8 + $0x8] sm:$0xff] }
  0x3f   :  { %1247 = vpow2.f32 %v189_v19  ;;  %v138_v40 = vand.u32 2147483647, %v1568_v37  ;;  %v133_v58 = vand.u32 2147483647, %v1571_v52  ;;  %v132_v62 = vmax.f32 %v1538_v1, 0.0 }
  0x40   :  { %1249 = vpow2.f32 %v187_v24  ;;  %v181_v38 = vmul.f32 1.442695, %v157_v34  ;;  %v155_v39 = vsub.f32 0.0, %v139_v36  ;;  %v179_v41 = vmul.f32 1.442695, %v156_v35 }
  0x41   :  { %1251 = vpow2.f32 %v185_v32  ;;  %v154_v44 = vsub.f32 0.0, %v138_v40  ;;  %v131_v4 = vmax.f32 %v1541_v3, 0.0  ;;  %v134_v9 = vand.u32 2147483647, %v1576_v57 }
  0x42   :  { %1253 = vpow2.f32 %v183_v33  ;;  %v177_v42 = vmul.f32 1.442695, %v155_v39  ;;  %v130_v11 = vmax.f32 %v1544_v5, 0.0  ;;  %v149_v12 = vsub.f32 0.0, %v133_v58 }
  0x43   :  { %1255 = vpow2.f32 %v181_v38  ;;  %v175_v51 = vmul.f32 1.442695, %v154_v44  ;;  %v129_v3 = vmax.f32 %v1547_v8, 0.0  ;;  %v128_v26 = vmax.f32 %v1550_v13, 0.0  ;;  %v1650_v44 = vld [vmem:[%s1925_s4] sm:$0x1] }
  0x44   :  { %1257 = vpow2.f32 %v179_v41  ;;  %v1596_v5 = vsub.f32 0.0, %v134_v9  ;;  %v165_v33 = vmul.f32 1.442695, %v149_v12  ;;  %v100_v9 = vld [vmem:[#allocation6 + $0x78] sm:$0xff]  ;;  %v124_v13 = vmax.f32 %v1562_v29, 0.0 }
  0x45   :  { %1259 = vpow2.f32 %v177_v42 }
  0x46   :  { %v167_v8 = vmul.f32 1.442695, %v1596_v5  ;;  %v97_v5 = vld [vmem:[#allocation6 + $0x60] sm:$0xff] }
  0x49   :  { %v1242_v43 = vpop.eup %1241 }
  0x4a   :  { %v1244_v45 = vpop.eup %1243  ;;  %v332_v46 = vadd.f32 1.0, %v1242_v43  ;;  %v335_v55 = vmul.f32 -0.5, %v1242_v43  ;;  %v338_v15 = vand.u32 2147483647, %v1242_v43 }
  0x4b   :  { %v1246_v47 = vpop.eup %1245  ;;  %v323_v48 = vadd.f32 1.0, %v1244_v45  ;;  %v326_v60 = vmul.f32 -0.5, %v1244_v45  ;;  %v329_v16 = vand.u32 2147483647, %v1244_v45 }
  0x4c   :  { %v1248_v49 = vpop.eup %1247  ;;  %1261 = vlog2.f32 %v332_v46  ;;  %v314_v50 = vadd.f32 1.0, %v1246_v47  ;;  %v317_v63 = vmul.f32 -0.5, %v1246_v47  ;;  %v336_v10 = vadd.f32 1.0, %v335_v55  ;;  %v372_v55 = vld [vmem:[#allocation9 + $0x78] sm:$0xff] }
  0x4d   :  { %1263 = vlog2.f32 %v323_v48  ;;  %v1573_v53 = vpop.eup %1249  ;;  %v305_v54 = vadd.f32 1.0, %v1248_v49  ;;  %v308_v6 = vmul.f32 -0.5, %v1248_v49  ;;  %v327_v1 = vadd.f32 1.0, %v326_v60 }
  0x4e   :  { %1265 = vlog2.f32 %v314_v50  ;;  %v296_v56 = vadd.f32 1.0, %v1573_v53  ;;  %v1579_v59 = vpop.eup %1251  ;;  %v299_v17 = vmul.f32 -0.5, %v1573_v53  ;;  %v318_v19 = vadd.f32 1.0, %v317_v63 }
  0x4f   :  { %1267 = vlog2.f32 %v305_v54  ;;  %v1581_v61 = vpop.eup %1253  ;;  %v287_v2 = vadd.f32 1.0, %v1579_v59  ;;  %v320_v20 = vand.u32 2147483647, %v1246_v47  ;;  %v311_v22 = vand.u32 2147483647, %v1248_v49 }
  0x50   :  { %1269 = vpow2.f32 %v175_v51  ;;  %v278_v7 = vadd.f32 1.0, %v1581_v61  ;;  %v1589_v14 = vpop.eup %1255  ;;  %v309_v24 = vadd.f32 1.0, %v308_v6  ;;  %v337_v28 = vmul.f32 %v1242_v43, %v336_v10 }
  0x51   :  { %1271 = vlog2.f32 %v296_v56  ;;  %v1593_v23 = vpop.eup %1257  ;;  %v302_v30 = vand.u32 2147483647, %v1573_v53  ;;  %v269_v32 = vadd.f32 1.0, %v1589_v14  ;;  %vm1602_vm0 = vcmp.lt.f32.partialorder %v338_v15, 0.0004427343 }
  0x52   :  { %1273 = vlog2.f32 %v287_v2  ;;  %v1598_v27 = vpop.eup %1259  ;;  %v328_v36 = vmul.f32 %v1244_v45, %v327_v1  ;;  %vm1606_vm1 = vcmp.lt.f32.partialorder %v329_v16, 0.0004427343  ;;  %v300_v39 = vadd.f32 1.0, %v299_v17 }
  0x53   :  { %1275 = vlog2.f32 %v278_v7  ;;  %v319_v42 = vmul.f32 %v1246_v47, %v318_v19  ;;  %vm1610_vm2 = vcmp.lt.f32.partialorder %v320_v20, 0.0004427343  ;;  %vm1614_vm3 = vcmp.lt.f32.partialorder %v311_v22, 0.0004427343  ;;  %v1635_v20 = vld [vmem:[#allocation8 + $0x20] sm:$0xff] }
  0x54   :  { %v310_v50 = vmul.f32 %v1248_v49, %v309_v24  ;;  %v290_v45 = vmul.f32 -0.5, %v1579_v59  ;;  %v260_v51 = vadd.f32 1.0, %v1593_v23  ;;  %vm1622_vm4 = vcmp.lt.f32.partialorder %v302_v30, 0.0004427343  ;;  %v371_v49 = vld [vmem:[#allocation9 + $0x70] sm:$0xff]  ;;  %v370_v24 = vld [vmem:[#allocation9 + $0x68] sm:$0xff] }
  0x55   :  { %1277 = vlog2.f32 %v269_v32  ;;  %v301_v2 = vmul.f32 %v1573_v53, %v300_v39  ;;  %v281_v6 = vmul.f32 -0.5, %v1581_v61  ;;  %v251_v1 = vadd.f32 1.0, %v1598_v27  ;;  %v99_v53 = vld [vmem:[#allocation6 + $0x70] sm:$0xff] }
  0x56   :  { %v291_v19 = vadd.f32 1.0, %v290_v45  ;;  %1279 = vlog2.f32 %v260_v51  ;;  %v284_v35 = vand.u32 2147483647, %v1581_v61  ;;  %v137_v39 = vand.u32 2147483647, %v1635_v20 }
  0x57   :  { %1281 = vpow2.f32 %v165_v33  ;;  %v282_v38 = vadd.f32 1.0, %v281_v6  ;;  %v272_v45 = vmul.f32 -0.5, %v1589_v14  ;;  %v275_v51 = vand.u32 2147483647, %v1589_v14 }
  0x58   :  { %1283 = vlog2.f32 %v251_v1  ;;  %v292_v43 = vmul.f32 %v1579_v59, %v291_v19  ;;  %vm1661_vm6 = vcmp.lt.f32.partialorder %v284_v35, 0.0004427343 }
  0x59   :  { %v1262_v34 = vpop.eup %1261  ;;  %v273_v6 = vadd.f32 1.0, %v272_v45  ;;  %vm1676_vm7 = vcmp.lt.f32.partialorder %v275_v51, 0.0004427343 }
  0x5a   :  { %v1264_v40 = vpop.eup %1263  ;;  %v334_v41 = vmul.f32 0.6931472, %v1262_v34  ;;  %v293_v34 = vand.u32 2147483647, %v1579_v59 }
  0x5b   :  { %v1266_v46 = vpop.eup %1265  ;;  %v325_v48 = vmul.f32 0.6931472, %v1264_v40 }
  0x5c   :  { %v340_v54 = vsel %vm1602_vm0, %v337_v28, %v334_v41  ;;  %v316_v47 = vmul.f32 0.6931472, %v1266_v46  ;;  %v1268_v58 = vpop.eup %1267  ;;  %v98_v41 = vld [vmem:[#allocation6 + $0x68] sm:$0xff]  ;;  %vm1657_vm5 = vcmp.lt.f32.partialorder %v293_v34, 0.0004427343 }
  0x5d   :  { %v356_v60 = vadd.f32 %v340_v54, %v132_v62  ;;  %v331_v63 = vsel %vm1606_vm1, %v328_v36, %v325_v48  ;;  %v1630_v7 = vpop.eup %1269  ;;  %v307_v15 = vmul.f32 0.6931472, %v1268_v58  ;;  %v127_v36 = vmax.f32 %v1553_v18, 0.0  ;;  %v369_v18 = vld [vmem:[#allocation9 + $0x60] sm:$0xff] }
  0x5e   :  { %v355_v10 = vadd.f32 %v331_v63, %v131_v4  ;;  %v322_v12 = vsel %vm1610_vm2, %v319_v42, %v316_v47  ;;  %v1272_v16 = vpop.eup %1271  ;;  %v283_v54 = vmul.f32 %v1581_v61, %v282_v38  ;;  %v153_v47 = vsub.f32 0.0, %v137_v39  ;;  %v1694_v39 = vld [vmem:[#allocation8 + $0x10] sm:$0xff] }
  0x5f   :  { %v388_v62 = vmul.f32 %v372_v55, %v356_v60  ;;  %v354_v17 = vadd.f32 %v322_v12, %v130_v11  ;;  %v313_v28 = vsel %vm1614_vm3, %v310_v50, %v307_v15  ;;  %v298_v4 = vmul.f32 0.6931472, %v1272_v16  ;;  %v1274_v30 = vpop.eup %1273 }
  0x60   :  { %v387_v22 = vmul.f32 %v371_v49, %v355_v10  ;;  %v242_v11 = vadd.f32 1.0, %v1630_v7  ;;  %v353_v33 = vadd.f32 %v313_v28, %v129_v3  ;;  %v1276_v46 = vpop.eup %1275  ;;  %v289_v50 = vmul.f32 0.6931472, %v1274_v30  ;;  %v368_v49 = vld [vmem:[#allocation9 + $0x58] sm:$0xff] }
  0x61   :  { %v404_v32 = vadd.f32 %v388_v62, %v100_v9  ;;  %v386_v42 = vmul.f32 %v370_v24, %v354_v17  ;;  %v304_v48 = vsel %vm1622_vm4, %v301_v2, %v298_v4  ;;  %v263_v55 = vmul.f32 -0.5, %v1593_v23  ;;  %v1682_v17 = vld [vmem:[#allocation8 + $0x18] sm:$0xff]  ;;  %v367_v24 = vld [vmem:[#allocation9 + $0x50] sm:$0xff] }
  0x62   :  { %v403_v40 = vadd.f32 %v387_v22, %v99_v53  ;;  %1285 = vlog2.f32 %v242_v11  ;;  %v385_v58 = vmul.f32 %v369_v18, %v353_v33  ;;  %v352_v60 = vadd.f32 %v304_v48, %v128_v26  ;;  %v1278_v10 = vpop.eup %1277  ;;  %v96_v53 = vld [vmem:[#allocation6 + $0x58] sm:$0xff]  ;;  %v95_v48 = vld [vmem:[#allocation6 + $0x50] sm:$0xff] }
  0x63   :  { %1188 = vmatpush3.xpose.msra.mxu0 %v404_v32  ;;  %1287 = vpow2.f32 %v167_v8  ;;  %v402_v56 = vadd.f32 %v386_v42, %v98_v41  ;;  %v280_v63 = vmul.f32 0.6931472, %v1276_v46  ;;  %v295_v2 = vsel %vm1657_vm5, %v292_v43, %v289_v50  ;;  %v1280_v28 = vpop.eup %1279  ;;  %v366_v50 = vld [vmem:[#allocation9 + $0x48] sm:$0xff] }
  0x64   :  { %1189 = vmatprep.subr.mxu0 %v1461_v0  ;;  %v173_v61 = vmul.f32 1.442695, %v153_v47  ;;  %v408_v9 = vand.u32 2147483647, %v1650_v44  ;;  %v126_v12 = vmax.f32 %v1555_v21, 0.0  ;;  %v125_v15 = vmax.f32 %v1559_v25, 0.0  ;;  %v1689_v35 = vpop.eup %1281 }
  0x65   :  { %v264_v26 = vadd.f32 1.0, %v263_v55  ;;  %v254_v16 = vmul.f32 -0.5, %v1598_v27  ;;  %v401_v19 = vadd.f32 %v385_v58, %v97_v5  ;;  %v384_v22 = vmul.f32 %v368_v49, %v352_v60 }
  0x66   :  { %1289 = vpow2.f32 %v173_v61  ;;  %v409_v62 = vsub.f32 0.0, %v408_v9  ;;  %v351_v21 = vadd.f32 %v295_v2, %v127_v36  ;;  %v286_v25 = vsel %vm1661_vm6, %v283_v54, %v280_v63  ;;  %v365_v61 = vld [vmem:[#allocation9 + $0x40] sm:$0xff]  ;;  %v90_v2 = vld [vmem:[#allocation6 + $0x28] sm:$0xff] }
  0x67   :  { %1190 = vmatpush3.xpose.msra.mxu0 %v403_v40  ;;  %v271_v4 = vmul.f32 0.6931472, %v1278_v10  ;;  %v274_v30 = vmul.f32 %v1589_v14, %v273_v6  ;;  %v266_v32 = vand.u32 2147483647, %v1593_v23  ;;  %v257_v11 = vand.u32 2147483647, %v1598_v27  ;;  %v1284_v14 = vpop.eup %1283 }
  0x68   :  { %1191 = vmatprep.subr.mxu0 %v1461_v0  ;;  %v410_v34 = vmul.f32 1.442695, %v409_v62  ;;  %v245_v38 = vmul.f32 -0.5, %v1630_v7  ;;  %v136_v36 = vand.u32 2147483647, %v1682_v17  ;;  %v350_v40 = vadd.f32 %v286_v25, %v126_v12  ;;  %v94_v6 = vld [vmem:[#allocation6 + $0x48] sm:$0xff] }
  0x69   :  { %v265_v41 = vmul.f32 %v1593_v23, %v264_v26  ;;  %v255_v42 = vadd.f32 1.0, %v254_v16  ;;  %v197_v33 = vadd.f32 1.0, %v1689_v35  ;;  %v400_v43 = vadd.f32 %v384_v22, %v96_v53 }
  0x6a   :  { %v383_v46 = vmul.f32 %v367_v24, %v351_v21  ;;  %v262_v18 = vmul.f32 0.6931472, %v1280_v28  ;;  %1291 = vpow2.f32 %v410_v34  ;;  %v277_v45 = vsel %vm1676_vm7, %v274_v30, %v271_v4  ;;  %v364_v21 = vld [vmem:[#allocation9 + $0x38] sm:$0xff] }
  0x6b   :  { %1192 = vmatpush3.xpose.msra.mxu0 %v402_v56  ;;  %1293 = vlog2.f32 %v197_v33  ;;  %v152_v8 = vsub.f32 0.0, %v136_v36  ;;  %v135_v23 = vand.u32 2147483647, %v1694_v39  ;;  %vm1702_vm8 = vcmp.lt.f32.partialorder %v266_v32, 0.0004427343  ;;  %v363_v32 = vld [vmem:[#allocation9 + $0x30] sm:$0xff] }
  0x6c   :  { %1193 = vmatprep.subr.mxu0 %v1461_v0  ;;  %v246_v59 = vadd.f32 1.0, %v245_v38  ;;  %v248_v51 = vand.u32 2147483647, %v1630_v7  ;;  %v253_v55 = vmul.f32 0.6931472, %v1284_v14  ;;  %v256_v47 = vmul.f32 %v1598_v27, %v255_v42  ;;  %v92_v36 = vld [vmem:[#allocation6 + $0x38] sm:$0xff] }
  0x6d   :  { %v171_v56 = vmul.f32 1.442695, %v152_v8  ;;  %v151_v5 = vsub.f32 0.0, %v135_v23  ;;  %v399_v60 = vadd.f32 %v383_v46, %v95_v48  ;;  %v382_v63 = vmul.f32 %v366_v50, %v350_v40  ;;  %v91_v46 = vld [vmem:[#allocation6 + $0x30] sm:$0xff]  ;;  %v1754_v23 = vld [vmem:[#allocation9] sm:$0xff] }
  0x6e   :  { %v349_v49 = vadd.f32 %v277_v45, %v125_v15  ;;  %vm1711_vm10 = vcmp.lt.f32.partialorder %v257_v11, 0.0004427343  ;;  %v268_v27 = vsel %vm1702_vm8, %v265_v41, %v262_v18  ;;  %v200_v9 = vmul.f32 -0.5, %v1689_v35  ;;  %v362_v18 = vld [vmem:[#allocation9 + $0x28] sm:$0xff] }
  0x6f   :  { %1194 = vmatpush3.xpose.msra.mxu0 %v401_v19  ;;  %v1286_v54 = vpop.eup %1285  ;;  %1295 = vpow2.f32 %v171_v56  ;;  %v123_v12 = vmax.f32 %v1565_v31, 0.0  ;;  %v247_v15 = vmul.f32 %v1630_v7, %v246_v59  ;;  %v169_v1 = vmul.f32 1.442695, %v151_v5  ;;  %v93_v7 = vld [vmem:[#allocation6 + $0x40] sm:$0xff] }
  0x70   :  { %1195 = vmatprep.subr.mxu0 %v1461_v0  ;;  %v1709_v58 = vpop.eup %1287  ;;  %v259_v26 = vsel %vm1711_vm10, %v256_v47, %v253_v55  ;;  %v244_v16 = vmul.f32 0.6931472, %v1286_v54  ;;  %vm1724_vm11 = vcmp.lt.f32.partialorder %v248_v51, 0.0004427343  ;;  %v398_v53 = vadd.f32 %v382_v63, %v94_v6  ;;  %v85_v63 = vld [vmem:[#allocation6] sm:$0xff] }
  0x71   :  { %v206_v10 = vadd.f32 1.0, %v1709_v58  ;;  %v381_v22 = vmul.f32 %v365_v61, %v349_v49  ;;  %v348_v31 = vadd.f32 %v268_v27, %v124_v13  ;;  %v201_v24 = vadd.f32 1.0, %v200_v9 }
  0x72   :  { %v347_v28 = vadd.f32 %v259_v26, %v123_v12  ;;  %v122_v4 = vmax.f32 %v1568_v37, 0.0  ;;  %v203_v30 = vand.u32 2147483647, %v1689_v35  ;;  %v250_v34 = vsel %vm1724_vm11, %v247_v15, %v244_v16  ;;  %v1777_v16 = vld [vmem:[#allocation9 + $0x8] sm:$0xff] }
  0x73   :  { %1196 = vmatpush3.xpose.msra.mxu0 %v400_v43  ;;  %1297 = vlog2.f32 %v206_v10  ;;  %v1728_v19 = vpop.eup %1289  ;;  %v209_v29 = vmul.f32 -0.5, %v1709_v58  ;;  %v397_v13 = vadd.f32 %v381_v22, %v93_v7  ;;  %v380_v11 = vmul.f32 %v364_v21, %v348_v31 }
  0x74   :  { %1197 = vmatprep.subr.mxu0 %v1461_v0  ;;  %1299 = vpow2.f32 %v169_v1  ;;  %v233_v25 = vadd.f32 1.0, %v1728_v19  ;;  %v117_v40 = vmax.f32 %v1571_v52, 0.0  ;;  %v202_v37 = vmul.f32 %v1689_v35, %v201_v24 }
  0x75   :  { %v379_v42 = vmul.f32 %v363_v32, %v347_v28  ;;  %v346_v33 = vadd.f32 %v250_v34, %v122_v4  ;;  %vm1744_vm12 = vcmp.lt.f32.partialorder %v203_v30, 0.0004427343  ;;  %v210_v50 = vadd.f32 1.0, %v209_v29  ;;  %v361_v29 = vld [vmem:[#allocation9 + $0x20] sm:$0xff] }
  0x76   :  { %1301 = vlog2.f32 %v233_v25  ;;  %v236_v45 = vmul.f32 -0.5, %v1728_v19  ;;  %v396_v8 = vadd.f32 %v380_v11, %v92_v36  ;;  %v212_v52 = vand.u32 2147483647, %v1709_v58 }
  0x77   :  { %1198 = vmatpush3.xpose.msra.mxu0 %v399_v60  ;;  %v1739_v38 = vpop.eup %1291  ;;  %v395_v59 = vadd.f32 %v379_v42, %v91_v46  ;;  %v378_v51 = vmul.f32 %v362_v18, %v346_v33  ;;  %v118_v54 = vmax.f32 %v1576_v57, 0.0  ;;  %v211_v47 = vmul.f32 %v1709_v58, %v210_v50 }
  0x78   :  { %1199 = vmatprep.subr.mxu0 %v1461_v0  ;;  %v1294_v41 = vpop.eup %1293  ;;  %v412_v43 = vadd.f32 1.0, %v1739_v38  ;;  %v237_v56 = vadd.f32 1.0, %v236_v45  ;;  %v239_v5 = vand.u32 2147483647, %v1728_v19  ;;  %vm1762_vm13 = vcmp.lt.f32.partialorder %v212_v52, 0.0004427343 }
  0x79   :  { %v199_v48 = vmul.f32 0.6931472, %v1294_v41  ;;  %v415_v57 = vmul.f32 -0.5, %v1739_v38  ;;  %v427_v9 = vlaneseq  ;;  %v121_v10 = vmax.f32 %v1635_v20, 0.0 }
  0x7a   :  { %1303 = vlog2.f32 %v412_v43  ;;  %v394_v1 = vadd.f32 %v378_v51, %v90_v2  ;;  %v238_v62 = vmul.f32 %v1728_v19, %v237_v56  ;;  %vm1780_vm14 = vcmp.lt.f32.partialorder %v239_v5, 0.0004427343  ;;  %v86_v19 = vld [vmem:[#allocation6 + $0x8] sm:$0xff]  ;;  %v405_v2 = vld [vmem:[%s1924_s3] sm:$0x1]  ;;  %s1463_s3 = smov [#allocation11]  }
  0x7b   :  { %1200 = vmatpush3.xpose.msra.mxu0 %v398_v53  ;;  %v205_v35 = vsel %vm1744_vm12, %v202_v37, %v199_v48  ;;  %v416_v20 = vadd.f32 1.0, %v415_v57  ;;  %v418_v7 = vand.u32 2147483647, %v1739_v38  ;;  %v1787_v21 = vand.u32 127, %v427_v9 }
  0x7c   :  { %1201 = vmatprep.subr.mxu0 %v1461_v0  ;;  %v1756_v3 = vpop.eup %1295  ;;  %v341_v55 = vadd.f32 %v205_v35, %v117_v40  ;;  %v604_v30 = vmul.f32 0.5, %v1754_v23  ;;  %v89_v40 = vld [vmem:[#allocation6 + $0x20] sm:$0xff]  ;;  %v407_v43 = vmax.f32 %v1650_v44, 0.0  ;;  %v605_v50 = vmul.f32 0.5, %v1777_v16 }
  0x7d   :  { %v224_v60 = vadd.f32 1.0, %v1756_v3  ;;  %v227_v25 = vmul.f32 -0.5, %v1756_v3  ;;  %v230_v32 = vand.u32 2147483647, %v1756_v3  ;;  %v417_v41 = vmul.f32 %v1739_v38, %v416_v20  ;;  %v360_v20 = vld [vmem:[#allocation9 + $0x18] sm:$0xff] }
  0x7e   :  { %1305 = vlog2.f32 %v341_v55  ;;  %v373_v61 = vmul.f32 %v1754_v23, %v341_v55  ;;  %vm1803_vm15 = vcmp.lt.f32.partialorder %v418_v7, 0.0004427343  ;;  %v120_v52 = vmax.f32 %v1682_v17, 0.0  ;;  %v1830_v55 = vld [vmem:[%s1927_s6] sm:$0x1]  ;;  %s1132_s6 = sshll.u32 %s1463_s3, 4  ;;  %s1133_s6 = int_to_ptr.vmem [resolvable:$true] %s1132_s6 }
  0x7f   :  { %1202 = vmatpush3.xpose.msra.mxu0 %v397_v13  ;;  %1307 = vlog2.f32 %v224_v60  ;;  %v228_v46 = vadd.f32 1.0, %v227_v25  ;;  %vm1817_vm0 = vcmp.lt.f32.partialorder %v230_v32, 0.0004427343  ;;  %v620_v57 = vmul.f32 %v604_v30, %v1754_v23  ;;  %v88_v30 = vld [vmem:[#allocation6 + $0x18] sm:$0xff]  ;;  %s1407_s12 = scalar_lea.vmem %s1133_s6, 128  ;;  %p1412_p7 = scmp.lt.s32.totalorder %s1133_s6, %s1133_s6 }
  0x80   :  { %1203 = vmatprep.subr.mxu0 %v1461_v0  ;;  %v1298_v49 = vpop.eup %1297  ;;  %v1773_v15 = vadd.f32 %v373_v61, %v85_v63  ;;  %vm538_vm2 = vcmp.lt.s32.totalorder %v1787_v21, 32  ;;  %vm555_vm3 = vcmp.lt.s32.totalorder %v1787_v21, 16  ;;  %vm699_vm4 = vcmask 1040384   ;;  %p1408_p6 = scmp.ne.s32.totalorder %s1133_s6, %s1407_s12  ;;  %p1413_p8 = scmp.lt.s32.totalorder %s1407_s12, %s1407_s12 }
  0x81   :  { %v1768_v27 = vpop.eup %1299  ;;  %v208_v58 = vmul.f32 0.6931472, %v1298_v49  ;;  %v229_v60 = vmul.f32 %v1756_v3, %v228_v46 }
  0x82   :  { %v215_v12 = vadd.f32 1.0, %v1768_v27  ;;  %v714_v28 = vmul.f32 %v1773_v15, %v1773_v15  ;;  %v218_v13 = vmul.f32 -0.5, %v1768_v27  ;;  %v221_v63 = vand.u32 2147483647, %v1768_v27  ;;  %p1414_p9 = por %p1413_p8, %p1412_p7 }
  0x83   :  { %1204 = vmatpush3.xpose.msra.mxu0 %v396_v8  ;;  %v214_v26 = vsel %vm1762_vm13, %v211_v47, %v208_v58  ;;  %v1302_v22 = vpop.eup %1301 }
  0x84   :  { %1205 = vmatprep.subr.mxu0 %v1461_v0  ;;  %v342_v31 = vadd.f32 %v214_v26, %v118_v54  ;;  %1309 = vlog2.f32 %v215_v12  ;;  %v235_v24 = vmul.f32 0.6931472, %v1302_v22  ;;  %v1798_v11 = vmul.f32 0.5, %v714_v28  ;;  %p1415_p10 = pnand %p1414_p9, %p1408_p6 }
  0x85   :  { %v1800_v36 = vmul.f32 81377.4, %v714_v28  ;;  %vm1854_vm1 = vcmp.lt.f32.partialorder %v221_v63, 0.0004427343 }
  0x86   :  { %v374_v4 = vmul.f32 %v1777_v16, %v342_v31  ;;  %1311 = vlog2.f32 %v342_v31  ;;  %v241_v34 = vsel %vm1780_vm14, %v238_v62, %v235_v24  ;;  %v746_v18 = vsub.f32 -0.6931472, %v1798_v11 }
  0x87   :  { %1206 = vmatpush3.xpose.msra.mxu0 %v395_v59  ;;  %v345_v37 = vadd.f32 %v241_v34, %v121_v10  ;;  %v1304_v14 = vpop.eup %1303  ;;  %v778_v48 = vsub.f32 5.306853, %v1800_v36  ;;  %v219_v59 = vadd.f32 1.0, %v218_v13  ;;  %v119_v62 = vmax.f32 %v1694_v39, 0.0 }
  0x88   :  { %1207 = vmatprep.subr.mxu0 %v1461_v0  ;;  %v1807_v33 = vadd.f32 %v374_v4, %v86_v19  ;;  %v414_v38 = vmul.f32 0.6931472, %v1304_v14  ;;  %v621_v4 = vmul.f32 %v605_v50, %v1777_v16  ;;  %v87_v50 = vld [vmem:[#allocation6 + $0x10] sm:$0xff] }
  0x89   :  { %v377_v45 = vmul.f32 %v361_v29, %v345_v37  ;;  %v810_v44 = vsub.f32 %v746_v18, %v778_v48  ;;  %v220_v53 = vmul.f32 %v1768_v27, %v219_v59  ;;  %v359_v37 = vld [vmem:[#allocation9 + $0x10] sm:$0xff] }
  0x8a   :  { %v715_v8 = vmul.f32 %v1807_v33, %v1807_v33  ;;  %v420_v54 = vsel %vm1803_vm15, %v417_v41, %v414_v38 }
  0x8b   :  { %1208 = vmatpush3.xpose.msra.mxu0 %v394_v1  ;;  %v393_v51 = vadd.f32 %v377_v45, %v89_v40  ;;  %v1306_v56 = vpop.eup %1305  ;;  %v421_v5 = vadd.f32 %v420_v54, %v407_v43  ;;  %v826_v49 = vand.u32 2147483647, %v810_v44  ;;  %v655_v44 = vmul.f32 0.5, %v1830_v55 }
  0x8c   :  { %1209 = vmatprep.subr.mxu0 %v1461_v0  ;;  %v1832_v17 = vmul.f32 0.5, %v715_v8  ;;  %v1834_v47 = vmul.f32 81377.4, %v715_v8  ;;  %v1308_v6 = vpop.eup %1307  ;;  %v557_v61 = vmul.f32 0.6931472, %v1306_v56 }
  0x8d   :  { %v423_v12 = vmul.f32 %v1830_v55, %v421_v5  ;;  %1313 = vlog2.f32 %v421_v5  ;;  %v226_v3 = vmul.f32 0.6931472, %v1308_v6  ;;  %v842_v1 = vsub.f32 0.0, %v826_v49 }
  0x8e   :  { %v747_v58 = vsub.f32 -0.6931472, %v1832_v17  ;;  %v779_v10 = vsub.f32 5.306853, %v1834_v47  ;;  %v588_v26 = vsub.f32 0.0, %v557_v61 }
  0x8f   :  { %1210 = vmatpush3.xpose.msra.mxu0 %v393_v51  ;;  %v232_v31 = vsel %vm1817_vm0, %v229_v60, %v226_v3  ;;  %v858_v24 = vmul.f32 1.442695, %v842_v1  ;;  %v1858_v25 = vadd.f32 %v423_v12, %v405_v2  ;;  %v656_v2 = vmul.f32 %v655_v44, %v1830_v55 }
  0x90   :  { %1211 = vmatprep.subr.mxu0 %v1461_v0  ;;  %v811_v23 = vsub.f32 %v747_v58, %v779_v10  ;;  %v344_v39 = vadd.f32 %v232_v31, %v120_v52  ;;  %v636_v29 = vsub.f32 %v588_v26, %v620_v57 }
  0x91   :  { %v1310_v22 = vpop.eup %1309  ;;  %1315 = vpow2.f32 %v858_v24  ;;  %v1050_v32 = vmul.f32 %v1858_v25, %v1858_v25 }
  0x92   :  { %v217_v19 = vmul.f32 0.6931472, %v1310_v22  ;;  %v827_v27 = vand.u32 2147483647, %v811_v23  ;;  %v376_v13 = vmul.f32 %v360_v20, %v344_v39  ;;  %v658_v59 = vsel %vm538_vm2, %v636_v29, 0.0 }
  0x93   :  { %v1312_v28 = vpop.eup %1311  ;;  %v1866_v14 = vmul.f32 0.5, %v1050_v32  ;;  %v1868_v43 = vmul.f32 81377.4, %v1050_v32 }
  0x94   :  { %v559_v34 = vmul.f32 0.6931472, %v1312_v28  ;;  %v223_v40 = vsel %vm1854_vm1, %v220_v53, %v217_v19  ;;  %v843_v42 = vsub.f32 0.0, %v827_v27  ;;  %v392_v16 = vadd.f32 %v376_v13, %v88_v30 }
  0x95   :  { %v343_v41 = vadd.f32 %v223_v40, %v119_v62  ;;  %v1052_v8 = vsub.f32 -0.6931472, %v1866_v14  ;;  %v1054_v52 = vsub.f32 5.306853, %v1868_v43  ;;  %v425_v62 = vld [vmem:[#allocation2] sm:$0xff] }
  0x96   :  { %v589_v46 = vsub.f32 0.0, %v559_v34  ;;  %v860_v38 = vmul.f32 1.442695, %v843_v42  ;;  %1212 = vmatpush3.xpose.msra.mxu0 %v392_v16  ;;  %v795_v34 = vmax.f32 %v747_v58, %v779_v10 }
  0x97   :  { %v375_v45 = vmul.f32 %v359_v37, %v343_v41  ;;  %1213 = vmatprep.subr.mxu0 %v1461_v0  ;;  %v1056_v54 = vsub.f32 %v1052_v8, %v1054_v52  ;;  %v1055_v17 = vmax.f32 %v1052_v8, %v1054_v52 }
  0x98   :  { %v637_v35 = vsub.f32 %v589_v46, %v621_v4  ;;  %1317 = vpow2.f32 %v860_v38 }
  0x99   :  { %v391_v51 = vadd.f32 %v375_v45, %v87_v50  ;;  %v1057_v60 = vand.u32 2147483647, %v1056_v54 }
  0x9a   :  { %v659_v56 = vsel %vm538_vm2, %v637_v35, 0.0  ;;  %v1314_v63 = vpop.eup %1313 }
  0x9b   :  { %v674_v5 = vadd.f32 %v659_v56, %v658_v59  ;;  %1214 = vmatpush3.xpose.msra.mxu0 %v391_v51  ;;  %v653_v49 = vmul.f32 0.6931472, %v1314_v63  ;;  %v1058_v6 = vsub.f32 0.0, %v1057_v60 }
  0x9c   :  { %1215 = vmatprep.subr.mxu0 %v1461_v0 }
  0x9d   :  { %689 = vadd.xlane.f32.xlu0 %v674_v5  ;;  %v654_v61 = vsub.f32 0.0, %v653_v49  ;;  %v1059_v57 = vmul.f32 1.442695, %v1058_v6 }
  0x9e   :  { %v1316_v12 = vpop.eup %1315 }
  0x9f   :  { %1216 = vmatpush3.xpose.msra.mxu0 %v1807_v33  ;;  %v657_v3 = vsub.f32 %v654_v61, %v656_v2  ;;  %v890_v1 = vadd.f32 1.0, %v1316_v12  ;;  %1319 = vpow2.f32 %v1059_v57  ;;  %v893_v23 = vmul.f32 -0.5, %v1316_v12 }
  0xa0   :  { %1217 = vmatprep.subr.mxu0 %v1461_v0  ;;  %v896_v31 = vand.u32 2147483647, %v1316_v12 }
  0xa1   :  { %v698_v26 = vsel %vm555_vm3, %v657_v3, 0.0  ;;  %1321 = vlog2.f32 %v890_v1  ;;  %v894_v33 = vadd.f32 1.0, %v893_v23 }
  0xa2   :  { %v700_v55 = vsel %vm699_vm4, %v698_v26, 0.0  ;;  %vm897_vm5 = vcmp.lt.f32.partialorder %v896_v31, 0.0004427343 }
  0xa3   :  { %1218 = vmatpush3.xpose.msra.mxu0 %v1773_v15  ;;  %701 = vadd.xlane.f32.xlu0 %v700_v55  ;;  %v895_v7 = vmul.f32 %v1316_v12, %v894_v33  ;;  %v794_v15 = vmax.f32 %v746_v18, %v778_v48 }
  0xa5   :  { %v1318_v53 = vpop.eup %1317 }
  0xa6   :  { %v899_v22 = vadd.f32 1.0, %v1318_v53  ;;  %1220 = vmatmul.mubr.f32.vlgmr.msra.gmra.mxu0 %v425_v62  ;;  %v902_v20 = vmul.f32 -0.5, %v1318_v53  ;;  %v905_v28 = vand.u32 2147483647, %v1318_v53 }
  0xa8   :  { %1323 = vlog2.f32 %v899_v22  ;;  %v903_v27 = vadd.f32 1.0, %v902_v20  ;;  %vm906_vm6 = vcmp.lt.f32.partialorder %v905_v28, 0.0004427343  ;;  %v428_v22 = vshrl.u32 %v427_v9, 7 }
  0xaa   :  { %v904_v30 = vmul.f32 %v1318_v53, %v903_v27  ;;  %v429_v33 = vsub.s32 0, %v428_v22 }
  0xac   :  { %v1320_v0 = vpop.eup %1319  ;;  %v430_v31 = vrot.slane %v1858_v25, %v429_v33 }
  0xad   :  { %v1061_v39 = vadd.f32 1.0, %v1320_v0  ;;  %v1064_v13 = vmul.f32 -0.5, %v1320_v0  ;;  %v1067_v18 = vand.u32 2147483647, %v1320_v0 }
  0xae   :  { %v1322_v24 = vpop.eup %1321 }
  0xaf   :  { %v892_v19 = vmul.f32 0.6931472, %v1322_v24  ;;  %1325 = vlog2.f32 %v1061_v39  ;;  %v1065_v36 = vadd.f32 1.0, %v1064_v13  ;;  %vm1068_vm7 = vcmp.lt.f32.partialorder %v1067_v18, 0.0004427343 }
  0xb1   :  { %v898_v4 = vsel %vm897_vm5, %v895_v7, %v892_v19  ;;  %v1066_v46 = vmul.f32 %v1320_v0, %v1065_v36 }
  0xb2   :  { %v1034_v29 = vadd.f32 %v898_v4, %v794_v15 }
  0xb4   :  { %v1071_v11 = vsel %vm538_vm2, %v1034_v29, 0.0 }
  0xb5   :  { %v1324_v32 = vpop.eup %1323 }
  0xb6   :  { %v901_v40 = vmul.f32 0.6931472, %v1324_v32 }
  0xb8   :  { %v907_v37 = vsel %vm906_vm6, %v904_v30, %v901_v40 }
  0xb9   :  { %v1035_v41 = vadd.f32 %v907_v37, %v795_v34 }
  0xbb   :  { %v1072_v48 = vsel %vm538_vm2, %v1035_v41, 0.0 }
  0xbc   :  { %v1087_v42 = vadd.f32 %v1072_v48, %v1071_v11  ;;  %v1326_v47 = vpop.eup %1325 }
  0xbd   :  { %v1063_v58 = vmul.f32 0.6931472, %v1326_v47 }
  0xbe   :  { %1102 = vadd.xlane.f32.xlu1 %v1087_v42 }
  0xbf   :  { %v1069_v10 = vsel %vm1068_vm7, %v1066_v46, %v1063_v58 }
  0xc0   :  { %v1070_v16 = vadd.f32 %v1069_v10, %v1055_v17 }
  0xc2   :  { %v1111_v50 = vsel %vm555_vm3, %v1070_v16, 0.0 }
  0xc3   :  { %v1112_v45 = vsel %vm699_vm4, %v1111_v50, 0.0 }
  0xc4   :  { %1113 = vadd.xlane.f32.xlu1 %v1112_v45 }
 0x126   :  { %v690_v38 = vpop.xlane.xlu0 %689 }
 0x127   :  { %v691_v35 = vrot.slane %v690_v38, 4 }
 0x129   :  { %v692_v59 = vadd.f32 %v691_v35, %v690_v38 }
 0x12b   :  { %v693_v44 = vrot.slane %v692_v59, 2 }
 0x12c   :  { %v702_v54 = vpop.xlane.xlu0 %701 }
 0x12d   :  { %v694_v51 = vadd.f32 %v693_v44, %v692_v59  ;;  %v703_v43 = vrot.slane %v702_v54, 4 }
 0x12f   :  { %v695_v56 = vrot.slane %v694_v51, 1  ;;  %v704_v14 = vadd.f32 %v703_v43, %v702_v54 }
 0x131   :  { %v696_v8 = vadd.f32 %v695_v56, %v694_v51  ;;  %v705_v52 = vrot.slane %v704_v14, 2 }
 0x133   :  { %1222 = vpush %v696_v8  ;;  %v706_v5 = vadd.f32 %v705_v52, %v704_v14 }
 0x135   :  { %v707_v60 = vrot.slane %v706_v5, 1 }
 0x137   :  { %v708_v63 = vadd.f32 %v707_v60, %v706_v5 }
 0x139   :  { %1224 = vpush %v708_v63 }
 0x147   :  { %v1103_v21 = vpop.xlane.xlu1 %1102 }
 0x148   :  { %v1104_v49 = vrot.slane %v1103_v21, 4 }
 0x14a   :  { %v1105_v2 = vadd.f32 %v1104_v49, %v1103_v21 }
 0x14c   :  { %v1106_v6 = vrot.slane %v1105_v2, 2 }
 0x14d   :  { %v1114_v57 = vpop.xlane.xlu1 %1113 }
 0x14e   :  { %v1107_v61 = vadd.f32 %v1106_v6, %v1105_v2  ;;  %v1115_v12 = vrot.slane %v1114_v57, 4 }
 0x150   :  { %v1108_v3 = vrot.slane %v1107_v61, 1  ;;  %v1116_v1 = vadd.f32 %v1115_v12, %v1114_v57 }
 0x152   :  { %v1109_v26 = vadd.f32 %v1108_v3, %v1107_v61  ;;  %v1117_v55 = vrot.slane %v1116_v1, 2 }
 0x154   :  { %1226 = vpush %v1109_v26  ;;  %v1118_v62 = vadd.f32 %v1117_v55, %v1116_v1 }
 0x156   :  { %v1119_v53 = vrot.slane %v1118_v62, 1 }
 0x158   :  { %v1120_v23 = vadd.f32 %v1119_v53, %v1118_v62 }
 0x15a   :  { %1228 = vpush %v1120_v23 }
 0x164   :  { %s1223_s11 = spop %1222 }
 0x166   :  { %v498_v20 = vpop.f32.mrf.mxu0 }
 0x167   :  { %v499_v0 = vadd.f32 %v498_v20, %v430_v31 }
 0x168   :  { %v1221_v7 = vpop.f32.mrf.mxu0 }
 0x169   :  { %502 = vst [vmem:[#allocation11] sm:$0xff] %v499_v0 }
 0x16a   :  { %1418 = shalt.err (!%p1415_p10)
}
 0x16b   :  { %1135 = dma.vmem_to_hbm [thread:$0]  %s1133_s6, 128, %s1928_s7, [#allocation4]  }
 0x16c   :  { %s1225_s15 = spop %1224  ;;  %s1464_s18 = smov [#allocation13]  }
 0x16d   :  { %s710_s16 = sadd.f32 %s1225_s15, %s1223_s11  ;;  %s1465_s24 = smov [#allocation12]  }
 0x16f   :  { %s1168_s17 = sadd.f32 -485.19955, %s710_s16 }
 0x171   :  { %713 = sst [smem:[#allocation13]] %s1168_s17 }
 0x172   :  { %1151 = dma.smem_to_hbm %s1464_s18, 16, %s1930_s9, [#allocation14]  }
 0x185   :  { %s1227_s21 = spop %1226 }
 0x18b   :  { %s1229_s22 = spop %1228 }
 0x18c   :  { %s1122_s23 = sadd.f32 %s1229_s22, %s1227_s21 }
 0x18e   :  { %s1169_s1 = sadd.f32 -485.19955, %s1122_s23 }
 0x190   :  { %1125 = sst [smem:[#allocation12]] %s1169_s1 }
 0x191   :  { %1143 = dma.smem_to_hbm %s1465_s24, 16, %s1929_s8, [#allocation5]  }
 0x192   :  { %1449 = dma.done.wait [#allocation4], 128  }
 0x193   :  { %1450 = vsyncadd [#allocation4], 4294967168 }
 0x194   :  { %1451 = dma.done.wait [#allocation5], 16  }
 0x195   :  { %1452 = vsyncadd [#allocation5], 4294967280 }
 0x196   :  { %1453 = dma.done.wait [#allocation14], 16  }
 0x197   :  { %1454 = vsyncadd [#allocation14], 4294967280 }
 0x198   :  { %1161 = sfence }
 0x199   :  { %1162 = vsyncpa [#allocation3], 1 }
 0x19a   :  { %1163 = vsyncpa [#allocation7], 1 }
 0x19b   :  { %1164 = vsyncpa [#allocation10], 1 }
 0x19c   :  { %1165 = vsyncpa [#allocation4], 1 }
 0x19d   :  { %1166 = vsyncpa [#allocation5], 1 }
 0x19e   :  { %1167 = vsyncpa [#allocation14], 1 }

</bundles_post_ra>
